<compile_context>
chip_gen: v6e
topology: v6e:2x2x1
jax: 0.10.0
libtpu: 0.0.40
codegen_flags: <defaults>
</compile_context>

<pallas_src>
import functools

import jax
import jax.numpy as jnp
from jax import lax
from jax.experimental import pallas as pl
from jax.experimental.pallas import tpu as pltpu

H = 100            # h_size_1 == h_size_2
HV = 5 * H         # value-branch first hidden (500)
H_PAD = 128        # 100 -> 128
HV_PAD = 512       # 500 -> 512
OUT_PAD = 128      # lane-dense head output slab (mu lanes + v lane + zero pad)
TB_MAX = 256       # max batch tile

ACT_SCALE = 1.0    # TODO(synk): `act_scale_value` is not defined in the reference
                   # file; plug the real scale here if known.


def _round_up(n, m):
    return (n + m - 1) // m * m


# --------------------------------------------------------------------------
# Kernel: whole forward for one batch tile.  All weights are VMEM-resident.
# --------------------------------------------------------------------------
def _ppo_kernel(x_ref,
                w1_ref, b1_ref,          # fused fc1  (IN_PAD, 640), (1, 640)
                pw2_ref, pb2_ref,        # p_fc2      (128, 128), (1, 128)
                vw2_ref, vb2_ref,        # v_fc2      (512, 128), (1, 128)
                wh_ref, bh_ref,          # fused head (256, 128), (1, 128)
                out_ref,                 # (TB, 128): lanes [0:no]=mu, [no]=v
                *, num_outputs):
    x = x_ref[...].astype(jnp.bfloat16)                       # (TB, IN_PAD)

    # ---- fused first layer: policy + value fc1 in one MXU push ----
    h1 = jnp.dot(x, w1_ref[...], preferred_element_type=jnp.float32)
    h1 = jnp.maximum(h1 + b1_ref[...], 0.0)                   # (TB, 640) f32
    h = h1[:, :H_PAD]                                         # (TB, 128)
    hv = h1[:, H_PAD:]                                        # (TB, 512)

    # ---- second layers ----
    h = jnp.tanh(
        jnp.dot(h.astype(jnp.bfloat16), pw2_ref[...],
                preferred_element_type=jnp.float32) + pb2_ref[...])      # (TB, 128)
    hv = jnp.tanh(
        jnp.dot(hv.astype(jnp.bfloat16), vw2_ref[...],
                preferred_element_type=jnp.float32) + vb2_ref[...])      # (TB, 128)

    # ---- fused block-diagonal head: mu and v in one matmul + one store ----
    hhv = jnp.concatenate([h, hv], axis=-1).astype(jnp.bfloat16)         # (TB, 256)
    head = jnp.dot(hhv, wh_ref[...],
                   preferred_element_type=jnp.float32) + bh_ref[...]     # (TB, 128)

    lane = lax.broadcasted_iota(jnp.int32, head.shape, dimension=1)
    # mu lanes get act_scale * tanh(.), the v lane stays linear; pad lanes are 0.
    out_ref[...] = jnp.where(lane < num_outputs,
                             ACT_SCALE * jnp.tanh(head), head)


# --------------------------------------------------------------------------
# Wrapper
# --------------------------------------------------------------------------
def ppo_forward(x, packed, *, num_outputs):
    """x: (B, num_inputs) f32.  packed: output of pack_params().
    Returns (mu, sigma_sq, v) matching the torch module."""
    B, num_inputs = x.shape
    in_pad = packed["w1"].shape[0]

    # batch tiling: TB multiple of 8, capped at TB_MAX; pad B to a TB multiple.
    tb = min(TB_MAX, _round_up(B, 8))
    b_pad = _round_up(B, tb)
    x_p = jnp.pad(x, ((0, b_pad - B), (0, in_pad - num_inputs)))

    weight_spec = lambda a: pl.BlockSpec(a.shape, lambda i: (0, 0))

    out = pl.pallas_call(
        functools.partial(_ppo_kernel, num_outputs=num_outputs),
        out_shape=jax.ShapeDtypeStruct((b_pad, OUT_PAD), jnp.float32),
        grid_spec=pltpu.PrefetchScalarGridSpec(
            num_scalar_prefetch=0,
            grid=(b_pad // tb,),
            in_specs=[
                pl.BlockSpec((tb, in_pad), lambda i: (i, 0)),   # x (pipelined)
                weight_spec(packed["w1"]), weight_spec(packed["b1"]),
                weight_spec(packed["pw2"]), weight_spec(packed["pb2"]),
                weight_spec(packed["vw2"]), weight_spec(packed["vb2"]),
                weight_spec(packed["wh"]), weight_spec(packed["bh"]),
            ],
            out_specs=pl.BlockSpec((tb, OUT_PAD), lambda i: (i, 0)),
        ),
        compiler_params=pltpu.CompilerParams(
            dimension_semantics=("parallel",)),
    )(x_p,
      packed["w1"], packed["b1"],
      packed["pw2"], packed["pb2"],
      packed["vw2"], packed["vb2"],
      packed["wh"], packed["bh"])

    mu = out[:B, :num_outputs]
    v = out[:B, num_outputs:num_outputs + 1]
    # sigma_sq is batch-independent -> computed in plain JAX (hoisted out of kernel)
    sigma_sq = jnp.exp(jnp.clip(packed["log_std"], -10.0, -2.3))
    return mu, sigma_sq, v


# --------------------------------------------------------------------------
# Parameter init (torch-shaped, f32) and packing into padded/fused bf16 slabs
# --------------------------------------------------------------------------
def init_params(key, num_inputs, num_outputs):
    """Weights stored as (in, out) (transposed vs torch); biases zero
    (the torch module fills them with 0); log_std = -2.3 * ones."""
    def linear(k, fan_in, fan_out):
        bound = 1.0 / jnp.sqrt(jnp.float32(fan_in))
        w = jax.random.uniform(k, (fan_in, fan_out), jnp.float32, -bound, bound)
        b = jnp.zeros((fan_out,), jnp.float32)
        return w, b

    keys = jax.random.split(key, 6)
    p_fc1_w, p_fc1_b = linear(keys[0], num_inputs, H)
    p_fc2_w, p_fc2_b = linear(keys[1], H, H)
    v_fc1_w, v_fc1_b = linear(keys[2], num_inputs, HV)
    v_fc2_w, v_fc2_b = linear(keys[3], HV, H)
    mu_w, mu_b = linear(keys[4], H, num_outputs)
    v_w, v_b = linear(keys[5], H, 1)
    log_std = -2.3 * jnp.ones((num_outputs,), jnp.float32)

    return {
        "p_fc1_w": p_fc1_w, "p_fc1_b": p_fc1_b,
        "p_fc2_w": p_fc2_w, "p_fc2_b": p_fc2_b,
        "v_fc1_w": v_fc1_w, "v_fc1_b": v_fc1_b,
        "v_fc2_w": v_fc2_w, "v_fc2_b": v_fc2_b,
        "mu_w": mu_w, "mu_b": mu_b,
        "v_w": v_w, "v_b": v_b,
        "log_std": log_std,
    }


def pack_params(params, num_inputs, num_outputs):
    """Pad to lane-dense shapes, fuse fc1 pair and mu/v heads, cast weights to bf16.
    All padding lanes/rows are exactly zero so relu/tanh of pad lanes stays 0."""
    in_pad = _round_up(num_inputs, 128)
    w_dt = jnp.bfloat16
    assert num_outputs + 1 <= OUT_PAD

    # fused first layer: columns [0:128) = policy fc1, [128:640) = value fc1
    w1 = jnp.zeros((in_pad, H_PAD + HV_PAD), jnp.float32)
    w1 = w1.at[:num_inputs, :H].set(params["p_fc1_w"])
    w1 = w1.at[:num_inputs, H_PAD:H_PAD + HV].set(params["v_fc1_w"])
    b1 = jnp.zeros((1, H_PAD + HV_PAD), jnp.float32)
    b1 = b1.at[0, :H].set(params["p_fc1_b"])
    b1 = b1.at[0, H_PAD:H_PAD + HV].set(params["v_fc1_b"])

    pw2 = jnp.zeros((H_PAD, H_PAD), jnp.float32).at[:H, :H].set(params["p_fc2_w"])
    pb2 = jnp.zeros((1, H_PAD), jnp.float32).at[0, :H].set(params["p_fc2_b"])
    vw2 = jnp.zeros((HV_PAD, H_PAD), jnp.float32).at[:HV, :H].set(params["v_fc2_w"])
    vb2 = jnp.zeros((1, H_PAD), jnp.float32).at[0, :H].set(params["v_fc2_b"])

    # block-diagonal head over concat(h, hv):
    #   rows [0:128)   (h)  -> columns [0:num_outputs)  = mu weights
    #   rows [128:256) (hv) -> column  num_outputs      = v weight
    wh = jnp.zeros((2 * H_PAD, OUT_PAD), jnp.float32)
    wh = wh.at[:H, :num_outputs].set(params["mu_w"])
    wh = wh.at[H_PAD:H_PAD + H, num_outputs:num_outputs + 1].set(params["v_w"])
    bh = jnp.zeros((1, OUT_PAD), jnp.float32)
    bh = bh.at[0, :num_outputs].set(params["mu_b"])
    bh = bh.at[0, num_outputs:num_outputs + 1].set(params["v_b"])

    return {
        "w1": w1.astype(w_dt), "b1": b1,
        "pw2": pw2.astype(w_dt), "pb2": pb2,
        "vw2": vw2.astype(w_dt), "vb2": vb2,
        "wh": wh.astype(w_dt), "bh": bh,
        "log_std": params["log_std"],
    }


# --------------------------------------------------------------------------
# Pure-JAX reference (mirrors the kernel's bf16-weight matmuls, f32 accumulate)
# --------------------------------------------------------------------------
def ppo_forward_ref(x, params):
    def mm(a, w):
        a = a.astype(jnp.bfloat16).astype(jnp.float32)
        w = w.astype(jnp.bfloat16).astype(jnp.float32)
        return jnp.dot(a, w, preferred_element_type=jnp.float32)

    h = jnp.maximum(mm(x, params["p_fc1_w"]) + params["p_fc1_b"], 0.0)
    h = jnp.tanh(mm(h, params["p_fc2_w"]) + params["p_fc2_b"])
    mu = ACT_SCALE * jnp.tanh(mm(h, params["mu_w"]) + params["mu_b"])
    sigma_sq = jnp.exp(jnp.clip(params["log_std"], -10.0, -2.3))
    hv = jnp.maximum(mm(x, params["v_fc1_w"]) + params["v_fc1_b"], 0.0)
    hv = jnp.tanh(mm(hv, params["v_fc2_w"]) + params["v_fc2_b"])
    v = mm(hv, params["v_w"]) + params["v_b"]
    return mu, sigma_sq, v


if __name__ == "__main__":
    B, NUM_INPUTS, NUM_OUTPUTS = 8, 32, 8

    key = jax.random.PRNGKey(0)
    k_param, k_x = jax.random.split(key)
    params = init_params(k_param, NUM_INPUTS, NUM_OUTPUTS)
    packed = pack_params(params, NUM_INPUTS, NUM_OUTPUTS)
    x = jax.random.normal(k_x, (B, NUM_INPUTS), jnp.float32)

    mu, sigma_sq, v = jax.block_until_ready(
        ppo_forward(x, packed, num_outputs=NUM_OUTPUTS))

    mu_r, sigma_r, v_r = ppo_forward_ref(x, params)
    assert mu.shape == (B, NUM_OUTPUTS)
    assert sigma_sq.shape == (NUM_OUTPUTS,)
    assert v.shape == (B, 1)
    assert jnp.allclose(mu, mu_r, atol=5e-3), float(jnp.max(jnp.abs(mu - mu_r)))
    assert jnp.allclose(sigma_sq, sigma_r, atol=1e-6)
    assert jnp.allclose(v, v_r, atol=5e-3), float(jnp.max(jnp.abs(v - v_r)))

    print("KERNEL_OK")
</pallas_src>

<mosaic_0001>
module attributes {stable_mosaic.version = 11 : i64} {
  func.func @_ppo_kernel(%arg0: i32, %arg1: memref<8x128xf32, #tpu.memory_space<vmem>>, %arg2: memref<128x640xbf16, #tpu.memory_space<vmem>>, %arg3: memref<1x640xf32, #tpu.memory_space<vmem>>, %arg4: memref<128x128xbf16, #tpu.memory_space<vmem>>, %arg5: memref<1x128xf32, #tpu.memory_space<vmem>>, %arg6: memref<512x128xbf16, #tpu.memory_space<vmem>>, %arg7: memref<1x128xf32, #tpu.memory_space<vmem>>, %arg8: memref<256x128xbf16, #tpu.memory_space<vmem>>, %arg9: memref<1x128xf32, #tpu.memory_space<vmem>>, %arg10: memref<8x128xf32, #tpu.memory_space<vmem>>) attributes {dimension_semantics = [#tpu.dimension_semantics<parallel>], iteration_bounds = array<i64: 1>, scalar_prefetch = 0 : i64, scratch_operands = 0 : i64, tpu.core_type = #tpu.core_type<tc>, window_params = [{transform_indices = @transform_0, window_bounds = array<i64: 8, 128>}, {pipeline_mode = #tpu.pipeline_mode<synchronous>, transform_indices = @transform_1, window_bounds = array<i64: 128, 640>}, {pipeline_mode = #tpu.pipeline_mode<synchronous>, transform_indices = @transform_2, window_bounds = array<i64: 1, 640>}, {pipeline_mode = #tpu.pipeline_mode<synchronous>, transform_indices = @transform_3, window_bounds = array<i64: 128, 128>}, {pipeline_mode = #tpu.pipeline_mode<synchronous>, transform_indices = @transform_4, window_bounds = array<i64: 1, 128>}, {pipeline_mode = #tpu.pipeline_mode<synchronous>, transform_indices = @transform_5, window_bounds = array<i64: 512, 128>}, {pipeline_mode = #tpu.pipeline_mode<synchronous>, transform_indices = @transform_6, window_bounds = array<i64: 1, 128>}, {pipeline_mode = #tpu.pipeline_mode<synchronous>, transform_indices = @transform_7, window_bounds = array<i64: 256, 128>}, {pipeline_mode = #tpu.pipeline_mode<synchronous>, transform_indices = @transform_8, window_bounds = array<i64: 1, 128>}, {transform_indices = @transform_9, window_bounds = array<i64: 8, 128>}]} {
    %c0 = arith.constant 0 : index
    %c0_0 = arith.constant 0 : index
    %0 = vector.load %arg1[%c0, %c0_0] : memref<8x128xf32, #tpu.memory_space<vmem>>, vector<8x128xf32>
    %1 = arith.truncf %0 : vector<8x128xf32> to vector<8x128xbf16>
    %c0_1 = arith.constant 0 : index
    %c0_2 = arith.constant 0 : index
    %2 = vector.load %arg2[%c0_1, %c0_2] : memref<128x640xbf16, #tpu.memory_space<vmem>>, vector<128x640xbf16>
    %cst = arith.constant dense<0.000000e+00> : vector<8x640xf32>
    %3 = tpu.matmul %1, %2, %cst {dimension_numbers = #tpu.dot_dimension_numbers<[1], [0], [0], [1], [0, 0, 1, 1], [], []>} : vector<8x128xbf16>, vector<128x640xbf16>, vector<8x640xf32> -> vector<8x640xf32>
    %c0_3 = arith.constant 0 : index
    %c0_4 = arith.constant 0 : index
    %4 = vector.load %arg3[%c0_3, %c0_4] : memref<1x640xf32, #tpu.memory_space<vmem>>, vector<1x640xf32>
    %5 = vector.broadcast %4 : vector<1x640xf32> to vector<8x640xf32>
    %6 = arith.addf %3, %5 : vector<8x640xf32>
    %cst_5 = arith.constant 0.000000e+00 : f32
    %7 = vector.broadcast %cst_5 : f32 to vector<8x640xf32>
    %8 = arith.maximumf %6, %7 : vector<8x640xf32>
    %9 = vector.extract_strided_slice %8 {offsets = [0, 0], sizes = [8, 128], strides = [1, 1]} : vector<8x640xf32> to vector<8x128xf32>
    %10 = vector.extract_strided_slice %8 {offsets = [0, 128], sizes = [8, 512], strides = [1, 1]} : vector<8x640xf32> to vector<8x512xf32>
    %11 = arith.truncf %9 : vector<8x128xf32> to vector<8x128xbf16>
    %c0_6 = arith.constant 0 : index
    %c0_7 = arith.constant 0 : index
    %12 = vector.load %arg4[%c0_6, %c0_7] : memref<128x128xbf16, #tpu.memory_space<vmem>>, vector<128x128xbf16>
    %cst_8 = arith.constant dense<0.000000e+00> : vector<8x128xf32>
    %13 = tpu.matmul %11, %12, %cst_8 {dimension_numbers = #tpu.dot_dimension_numbers<[1], [0], [0], [1], [0, 0, 1, 1], [], []>} : vector<8x128xbf16>, vector<128x128xbf16>, vector<8x128xf32> -> vector<8x128xf32>
    %c0_9 = arith.constant 0 : index
    %c0_10 = arith.constant 0 : index
    %14 = vector.load %arg5[%c0_9, %c0_10] : memref<1x128xf32, #tpu.memory_space<vmem>>, vector<1x128xf32>
    %15 = vector.broadcast %14 : vector<1x128xf32> to vector<8x128xf32>
    %16 = arith.addf %13, %15 : vector<8x128xf32>
    %17 = math.tanh %16 : vector<8x128xf32>
    %18 = arith.truncf %10 : vector<8x512xf32> to vector<8x512xbf16>
    %c0_11 = arith.constant 0 : index
    %c0_12 = arith.constant 0 : index
    %19 = vector.load %arg6[%c0_11, %c0_12] : memref<512x128xbf16, #tpu.memory_space<vmem>>, vector<512x128xbf16>
    %cst_13 = arith.constant dense<0.000000e+00> : vector<8x128xf32>
    %20 = tpu.matmul %18, %19, %cst_13 {dimension_numbers = #tpu.dot_dimension_numbers<[1], [0], [0], [1], [0, 0, 1, 1], [], []>} : vector<8x512xbf16>, vector<512x128xbf16>, vector<8x128xf32> -> vector<8x128xf32>
    %c0_14 = arith.constant 0 : index
    %c0_15 = arith.constant 0 : index
    %21 = vector.load %arg7[%c0_14, %c0_15] : memref<1x128xf32, #tpu.memory_space<vmem>>, vector<1x128xf32>
    %22 = vector.broadcast %21 : vector<1x128xf32> to vector<8x128xf32>
    %23 = arith.addf %20, %22 : vector<8x128xf32>
    %24 = math.tanh %23 : vector<8x128xf32>
    %25 = tpu.concatenate %17, %24 in 1 : vector<8x128xf32>, vector<8x128xf32> -> vector<8x256xf32>
    %26 = arith.truncf %25 : vector<8x256xf32> to vector<8x256xbf16>
    %c0_16 = arith.constant 0 : index
    %c0_17 = arith.constant 0 : index
    %27 = vector.load %arg8[%c0_16, %c0_17] : memref<256x128xbf16, #tpu.memory_space<vmem>>, vector<256x128xbf16>
    %cst_18 = arith.constant dense<0.000000e+00> : vector<8x128xf32>
    %28 = tpu.matmul %26, %27, %cst_18 {dimension_numbers = #tpu.dot_dimension_numbers<[1], [0], [0], [1], [0, 0, 1, 1], [], []>} : vector<8x256xbf16>, vector<256x128xbf16>, vector<8x128xf32> -> vector<8x128xf32>
    %c0_19 = arith.constant 0 : index
    %c0_20 = arith.constant 0 : index
    %29 = vector.load %arg9[%c0_19, %c0_20] : memref<1x128xf32, #tpu.memory_space<vmem>>, vector<1x128xf32>
    %30 = vector.broadcast %29 : vector<1x128xf32> to vector<8x128xf32>
    %31 = arith.addf %28, %30 : vector<8x128xf32>
    %32 = tpu.iota {dimensions = array<i32: 1>} : vector<8x128xi32>
    %c8_i32 = arith.constant 8 : i32
    %33 = vector.broadcast %c8_i32 : i32 to vector<8x128xi32>
    %34 = arith.cmpi slt, %32, %33 : vector<8x128xi32>
    %35 = math.tanh %31 : vector<8x128xf32>
    %cst_21 = arith.constant 1.000000e+00 : f32
    %36 = vector.broadcast %cst_21 : f32 to vector<8x128xf32>
    %37 = arith.mulf %36, %35 : vector<8x128xf32>
    %38 = arith.select %34, %37, %31 : vector<8x128xi1>, vector<8x128xf32>
    %c0_22 = arith.constant 0 : index
    %c0_23 = arith.constant 0 : index
    %39 = vector.load %arg10[%c0_22, %c0_23] : memref<8x128xf32, #tpu.memory_space<vmem>>, vector<8x128xf32>
    tpu.vector_store %arg10[%c0_22, %c0_23], %38 {strides = array<i32>} : memref<8x128xf32, #tpu.memory_space<vmem>>, vector<8x128xf32>,
    return
  }
  func.func @transform_0(%arg0: i32) -> (i32, i32) {
    %c0_i32 = arith.constant 0 : i32
    %c0_i32_0 = arith.constant 0 : i32
    return %arg0, %c0_i32 : i32, i32
  }
  func.func @transform_1(%arg0: i32) -> (i32, i32) {
    %c0_i32 = arith.constant 0 : i32
    %c0_i32_0 = arith.constant 0 : i32
    %c0_i32_1 = arith.constant 0 : i32
    return %c0_i32, %c0_i32_0 : i32, i32
  }
  func.func @transform_2(%arg0: i32) -> (i32, i32) {
    %c0_i32 = arith.constant 0 : i32
    %c0_i32_0 = arith.constant 0 : i32
    %c0_i32_1 = arith.constant 0 : i32
    return %c0_i32, %c0_i32_0 : i32, i32
  }
  func.func @transform_3(%arg0: i32) -> (i32, i32) {
    %c0_i32 = arith.constant 0 : i32
    %c0_i32_0 = arith.constant 0 : i32
    %c0_i32_1 = arith.constant 0 : i32
    return %c0_i32, %c0_i32_0 : i32, i32
  }
  func.func @transform_4(%arg0: i32) -> (i32, i32) {
    %c0_i32 = arith.constant 0 : i32
    %c0_i32_0 = arith.constant 0 : i32
    %c0_i32_1 = arith.constant 0 : i32
    return %c0_i32, %c0_i32_0 : i32, i32
  }
  func.func @transform_5(%arg0: i32) -> (i32, i32) {
    %c0_i32 = arith.constant 0 : i32
    %c0_i32_0 = arith.constant 0 : i32
    %c0_i32_1 = arith.constant 0 : i32
    return %c0_i32, %c0_i32_0 : i32, i32
  }
  func.func @transform_6(%arg0: i32) -> (i32, i32) {
    %c0_i32 = arith.constant 0 : i32
    %c0_i32_0 = arith.constant 0 : i32
    %c0_i32_1 = arith.constant 0 : i32
    return %c0_i32, %c0_i32_0 : i32, i32
  }
  func.func @transform_7(%arg0: i32) -> (i32, i32) {
    %c0_i32 = arith.constant 0 : i32
    %c0_i32_0 = arith.constant 0 : i32
    %c0_i32_1 = arith.constant 0 : i32
    return %c0_i32, %c0_i32_0 : i32, i32
  }
  func.func @transform_8(%arg0: i32) -> (i32, i32) {
    %c0_i32 = arith.constant 0 : i32
    %c0_i32_0 = arith.constant 0 : i32
    %c0_i32_1 = arith.constant 0 : i32
    return %c0_i32, %c0_i32_0 : i32, i32
  }
  func.func @transform_9(%arg0: i32) -> (i32, i32) {
    %c0_i32 = arith.constant 0 : i32
    %c0_i32_0 = arith.constant 0 : i32
    return %arg0, %c0_i32 : i32, i32
  }
}

</mosaic_0001>

<bundles_post_ra>
// kernel: tpu_custom_call.1
= control target key start
LH: loop header
LB: loop body
LE: loop exit
PB: predicated region body
PF: predicated region fallthrough
CT: control target
= control target key end

     0   :  { %14 = vsyncpa [#allocation3], 0  ;;  %s1814_s0 = inlined_call_operand.hbm [shape: f32[8,128], index: 0, kind: input, shape index: {}]   ;;  %s1815_s1 = inlined_call_operand.hbm [shape: bf16[128,640], index: 1, kind: input, shape index: {}]   ;;  %s1816_s2 = inlined_call_operand.hbm [shape: f32[1,640], index: 2, kind: input, shape index: {}]   ;;  %s1817_s3 = inlined_call_operand.hbm [shape: bf16[128,128], index: 3, kind: input, shape index: {}]   ;;  %s1818_s4 = inlined_call_operand.vmem [shape: f32[1,128], index: 4, kind: input, shape index: {}]   ;;  %s1819_s5 = inlined_call_operand.hbm [shape: bf16[512,128], index: 5, kind: input, shape index: {}]   ;;  %s1820_s6 = inlined_call_operand.vmem [shape: f32[1,128], index: 6, kind: input, shape index: {}]   ;;  %s1821_s7 = inlined_call_operand.hbm [shape: bf16[256,128], index: 7, kind: input, shape index: {}]   ;;  %s1822_s8 = inlined_call_operand.vmem [shape: f32[1,128], index: 8, kind: input, shape index: {}]   ;;  %s1823_s9 = inlined_call_operand.hbm [shape: f32[8,128], index: 9, kind: output, shape index: {}]  }
   0x1   :  { %15 = vsyncpa [#allocation6], 0 }
   0x2   :  { %16 = vsyncpa [#allocation9], 0 }
   0x3   :  { %17 = vsyncpa [#allocation12], 0 }
   0x4   :  { %18 = vsyncpa [#allocation4], 0  ;;  %s1691_s30 = smov [#allocation5]  }
   0x5   :  { %s34_s10 = sshll.u32 %s1691_s30, 4  ;;  %s35_s10 = int_to_ptr.vmem [resolvable:$true] %s34_s10 }
   0x6   :  { %s1549_s11 = scalar_lea.vmem %s35_s10, 5120  ;;  %p1554_p1 = scmp.lt.s32.totalorder %s35_s10, %s35_s10 }
   0x7   :  { %p1550_p0 = scmp.ne.s32.totalorder %s35_s10, %s1549_s11  ;;  %p1555_p2 = scmp.lt.s32.totalorder %s1549_s11, %s1549_s11 }
   0x9   :  { %p1556_p3 = por %p1555_p2, %p1554_p1 }
   0xb   :  { %p1557_p4 = pnand %p1556_p3, %p1550_p0 }
   0xd   :  { %1560 = shalt.err (!%p1557_p4)
}
   0xe   :  { %s1692_s12 = smov 320   ;;  %s1693_s13 = smov 20  }
   0xf   :  { %40 = dma.hbm_to_vmem [thread:$0]  %s1815_s1, 5120, %s35_s10, [#allocation6], %s1692_s12, %s1692_s12, %s1693_s13  }
  0x10   :  { %s1694_s16 = smov [#allocation8]  }
  0x11   :  { %s56_s17 = sshll.u32 %s1694_s16, 4  ;;  %s57_s17 = int_to_ptr.vmem [resolvable:$true] %s56_s17 }
  0x12   :  { %s1569_s18 = scalar_lea.vmem %s57_s17, 1024  ;;  %p1574_p6 = scmp.lt.s32.totalorder %s57_s17, %s57_s17 }
  0x13   :  { %p1570_p5 = scmp.ne.s32.totalorder %s57_s17, %s1569_s18  ;;  %p1575_p7 = scmp.lt.s32.totalorder %s1569_s18, %s1569_s18 }
  0x15   :  { %p1576_p8 = por %p1575_p7, %p1574_p6 }
  0x17   :  { %p1577_p9 = pnand %p1576_p8, %p1570_p5 }
  0x19   :  { %1580 = shalt.err (!%p1577_p9)
}
  0x1a   :  { %s1695_s19 = smov 64   ;;  %s1696_s20 = smov 4  }
  0x1b   :  { %62 = dma.hbm_to_vmem [thread:$0]  %s1817_s3, 1024, %s57_s17, [#allocation9], %s1695_s19, %s1695_s19, %s1696_s20  }
  0x1c   :  { %s1697_s1 = smov [#allocation2]   ;;  %s1698_s24 = smov [#allocation7]  }
  0x1d   :  { %s25_s23 = sshll.u32 %s1697_s1, 4  ;;  %s47_s25 = sshll.u32 %s1698_s24, 4  ;;  %s26_s23 = int_to_ptr.vmem [resolvable:$true] %s25_s23  ;;  %s48_s25 = int_to_ptr.vmem [resolvable:$true] %s47_s25 }
  0x1e   :  { %s1589_s26 = scalar_lea.vmem %s26_s23, 128  ;;  %p1594_p11 = scmp.lt.s32.totalorder %s26_s23, %s26_s23 }
  0x1f   :  { %p1590_p10 = scmp.ne.s32.totalorder %s26_s23, %s1589_s26  ;;  %p1595_p12 = scmp.lt.s32.totalorder %s1589_s26, %s1589_s26 }
  0x21   :  { %p1596_p13 = por %p1595_p12, %p1594_p11 }
  0x23   :  { %p1597_p0 = pnand %p1596_p13, %p1590_p10 }
  0x25   :  { %1600 = shalt.err (!%p1597_p0)
}
  0x26   :  { %28 = dma.hbm_to_vmem [thread:$0]  %s1814_s0, 128, %s26_s23, [#allocation3]  }
  0x27   :  { %s1609_s29 = scalar_lea.vmem %s48_s25, 80  ;;  %s1613_s3 = scalar_lea.vmem %s48_s25, 96 }
  0x28   :  { %p1610_p1 = scmp.ne.s32.totalorder %s48_s25, %s1609_s29  ;;  %p1614_p2 = scmp.lt.s32.totalorder %s48_s25, %s48_s25 }
  0x29   :  { %p1615_p3 = scmp.lt.s32.totalorder %s1613_s3, %s1609_s29 }
  0x2b   :  { %p1616_p4 = por %p1615_p3, %p1614_p2 }
  0x2d   :  { %p1617_p5 = pnand %p1616_p4, %p1610_p1 }
  0x2f   :  { %1620 = shalt.err (!%p1617_p5)
}
  0x30   :  { %50 = dma.hbm_to_vmem [thread:$0]  %s1816_s2, 80, %s48_s25, [#allocation6]  }
  0x31   :  { %s1699_s11 = smov [#allocation10]   ;;  %s1700_s13 = smov [#allocation11]  }
  0x32   :  { %s70_s12 = sshll.u32 %s1699_s11, 4  ;;  %s84_s14 = sshll.u32 %s1700_s13, 4  ;;  %s71_s12 = int_to_ptr.vmem [resolvable:$true] %s70_s12  ;;  %s85_s14 = int_to_ptr.vmem [resolvable:$true] %s84_s14 }
  0x33   :  { %s1629_s15 = scalar_lea.vmem %s71_s12, 4096  ;;  %p1634_p7 = scmp.lt.s32.totalorder %s71_s12, %s71_s12 }
  0x34   :  { %p1630_p6 = scmp.ne.s32.totalorder %s71_s12, %s1629_s15  ;;  %p1635_p8 = scmp.lt.s32.totalorder %s1629_s15, %s1629_s15 }
  0x36   :  { %p1636_p9 = por %p1635_p8, %p1634_p7 }
  0x38   :  { %p1637_p10 = pnand %p1636_p9, %p1630_p6 }
  0x3a   :  { %1640 = shalt.err (!%p1637_p10)
}
  0x3b   :  { %76 = dma.hbm_to_vmem [thread:$0]  %s1819_s5, 4096, %s71_s12, [#allocation9], %s1695_s19, %s1695_s19, %s1696_s20  }
  0x3c   :  { %s1649_s2 = scalar_lea.vmem %s85_s14, 2048  ;;  %p1654_p12 = scmp.lt.s32.totalorder %s85_s14, %s85_s14 }
  0x3d   :  { %p1650_p11 = scmp.ne.s32.totalorder %s85_s14, %s1649_s2  ;;  %p1655_p13 = scmp.lt.s32.totalorder %s1649_s2, %s1649_s2 }
  0x3f   :  { %p1656_p0 = por %p1655_p13, %p1654_p12 }
  0x41   :  { %p1657_p1 = pnand %p1656_p0, %p1650_p11 }
  0x43   :  { %1660 = shalt.err (!%p1657_p1)
}
  0x44   :  { %90 = dma.hbm_to_vmem [thread:$0]  %s1821_s7, 2048, %s85_s14, [#allocation12], %s1695_s19, %s1695_s19, %s1696_s20  }
  0x45   :  { %1681 = dma.done.wait [#allocation3], 128  }
  0x46   :  { %1682 = vsyncadd [#allocation3], 4294967168 }
  0x47   :  { %1683 = dma.done.wait [#allocation6], 5200  }
  0x48   :  { %1684 = vsyncadd [#allocation6], 4294962096 }
  0x49   :  { %1685 = dma.done.wait [#allocation9], 5120  }
  0x4a   :  { %1686 = vsyncadd [#allocation9], 4294962176 }
  0x4b   :  { %1687 = dma.done.wait [#allocation12], 2048  }
  0x4c   :  { %1688 = vsyncadd [#allocation12], 4294965248  ;;  %v1701_v0 = vmov 0   ;;  %v1423_v1 = vld [vmem:[#allocation5 + $0x11c] ss:$20 sps:$4 sm:$0xff]   ;;  %v1702_v36 = vmov 0.0  }
  0x4d   :  { %429 = vmatprep.mubr.bf16.mxu0 %v1701_v0  ;;  %470 = vmatprep.mubr.bf16.mxu1 %v1701_v0  ;;  %v1425_v2 = vld [vmem:[#allocation5 + $0x118] ss:$20 sps:$4 sm:$0xff]   ;;  %v1428_v4 = vld [vmem:[#allocation5 + $0x120] ss:$20 sps:$4 sm:$0xff]   ;;  %v1431_v6 = vld [vmem:[#allocation5 + $0xf0] ss:$20 sps:$4 sm:$0xff]  }
  0x4e   :  { %397 = vmatprep.subr.bf16.mxu0 %v1423_v1  ;;  %v1426_v3 = vld [vmem:[#allocation5 + $0x124] ss:$20 sps:$4 sm:$0xff]   ;;  %v1429_v5 = vld [vmem:[#allocation5 + $0xf4] ss:$20 sps:$4 sm:$0xff]   ;;  %v1432_v7 = vld [vmem:[#allocation5 + $0xfc] ss:$20 sps:$4 sm:$0xff]  }
  0x4f   :  { %398 = vmatpush1.bf16.msra.mxu0 %v1425_v2  ;;  %438 = vmatprep.subr.bf16.mxu1 %v1426_v3  ;;  %v1434_v8 = vld [vmem:[#allocation5 + $0xf8] ss:$20 sps:$4 sm:$0xff]   ;;  %v1437_v10 = vld [vmem:[#allocation5 + $0xc8] ss:$20 sps:$4 sm:$0xff]   ;;  %v1440_v13 = vld [vmem:[#allocation5 + $0xd0] ss:$20 sps:$4 sm:$0xff]  }
  0x50   :  { %439 = vmatpush1.bf16.msra.mxu1 %v1428_v4  ;;  %399 = vmatprep.subr.bf16.mxu0 %v1429_v5  ;;  %v1435_v9 = vld [vmem:[#allocation5 + $0xcc] ss:$20 sps:$4 sm:$0xff]   ;;  %v1438_v11 = vld [vmem:[#allocation5 + $0xd4] ss:$20 sps:$4 sm:$0xff]   ;;  %v1441_v12 = vld [vmem:[#allocation5 + $0xa4] ss:$20 sps:$4 sm:$0xff]   ;;  %v164_v5 = vlaneseq }
  0x51   :  { %440 = vmatprep.subr.bf16.mxu1 %v1432_v7  ;;  %v1444_v14 = vld [vmem:[#allocation5 + $0xac] ss:$20 sps:$4 sm:$0xff]   ;;  %v1447_v16 = vld [vmem:[#allocation5 + $0x7c] ss:$20 sps:$4 sm:$0xff]   ;;  %v1450_v18 = vld [vmem:[#allocation5 + $0x84] ss:$20 sps:$4 sm:$0xff]  }
  0x52   :  { %v1443_v15 = vld [vmem:[#allocation5 + $0xa0] ss:$20 sps:$4 sm:$0xff]   ;;  %v1446_v17 = vld [vmem:[#allocation5 + $0xa8] ss:$20 sps:$4 sm:$0xff]   ;;  %v1449_v19 = vld [vmem:[#allocation5 + $0x78] ss:$20 sps:$4 sm:$0xff]  }
  0x53   :  { %400 = vmatpush1.bf16.msra.mxu0 %v1431_v6  ;;  %v1453_v20 = vld [vmem:[#allocation5 + $0x54] ss:$20 sps:$4 sm:$0xff]   ;;  %v1456_v22 = vld [vmem:[#allocation5 + $0x5c] ss:$20 sps:$4 sm:$0xff]   ;;  %v1459_v24 = vld [vmem:[#allocation5 + $0x2c] ss:$20 sps:$4 sm:$0xff]  }
  0x54   :  { %401 = vmatprep.subr.bf16.mxu0 %v1435_v9  ;;  %441 = vmatpush1.bf16.msra.mxu1 %v1434_v8  ;;  %v1452_v21 = vld [vmem:[#allocation5 + $0x80] ss:$20 sps:$4 sm:$0xff]   ;;  %v1455_v23 = vld [vmem:[#allocation5 + $0x50] ss:$20 sps:$4 sm:$0xff]   ;;  %v1458_v25 = vld [vmem:[#allocation5 + $0x58] ss:$20 sps:$4 sm:$0xff]  }
  0x55   :  { %442 = vmatprep.subr.bf16.mxu1 %v1438_v11  ;;  %v1461_v26 = vld [vmem:[#allocation5 + $0x28] ss:$20 sps:$4 sm:$0xff]   ;;  %v1464_v28 = vld [vmem:[#allocation5 + $0x30] ss:$20 sps:$4 sm:$0xff]   ;;  %v1467_v30 = vld [vmem:[#allocation5] ss:$20 sps:$4 sm:$0xff]  }
  0x56   :  { %v1462_v27 = vld [vmem:[#allocation5 + $0x34] ss:$20 sps:$4 sm:$0xff]   ;;  %v1465_v29 = vld [vmem:[#allocation5 + $0x4] ss:$20 sps:$4 sm:$0xff]   ;;  %v1468_v31 = vld [vmem:[#allocation5 + $0xc] ss:$20 sps:$4 sm:$0xff]  }
  0x57   :  { %402 = vmatpush1.bf16.msra.mxu0 %v1437_v10  ;;  %v112_v32 = vld [vmem:[#allocation2] sm:$0xff]  ;;  %v1472_v38 = vld [vmem:[#allocation5 + $0x100] ss:$20 sps:$4 sm:$0xff]   ;;  %vm1703_vm0 = vmmov 0   ;;  %v1474_v42 = vld [vmem:[#allocation5 + $0xb0] ss:$20 sps:$4 sm:$0xff]  }
  0x58   :  { %403 = vmatprep.subr.bf16.mxu0 %v1441_v12  ;;  %443 = vmatpush1.bf16.msra.mxu1 %v1440_v13  ;;  %v1470_v33 = vld [vmem:[#allocation5 + $0x8] ss:$20 sps:$4 sm:$0xff]   ;;  %v113_v34 = vpack.c.bf16 %v112_v32, %v112_v32  ;;  %v1473_v40 = vld [vmem:[#allocation5 + $0xd8] ss:$20 sps:$4 sm:$0xff]   ;;  %v1476_v46 = vld [vmem:[#allocation5 + $0x60] ss:$20 sps:$4 sm:$0xff]  }
  0x59   :  { %444 = vmatprep.subr.bf16.mxu1 %v1444_v14  ;;  %v1471_v35 = vld [vmem:[#allocation5 + $0x128] ss:$20 sps:$4 sm:$0xff]   ;;  %v1485_v41 = vld [vmem:[#allocation8 + $0x28] sm:$0xff]   ;;  %v165_v6 = vshrl.u32 %v164_v5, 7  ;;  %v162_v8 = vld [vmem:[#allocation7] sm:$0x1f] }
  0x5a   :  { %v1479_v37 = vld [vmem:[#allocation8 + $0x38] sm:$0xff]   ;;  %v1482_v39 = vld [vmem:[#allocation8 + $0x30] sm:$0xff]   ;;  %v1488_v43 = vld [vmem:[#allocation8 + $0x20] sm:$0xff]  }
  0x5b   :  { %404 = vmatpush1.bf16.msra.mxu0 %v1443_v15  ;;  %v1475_v44 = vld [vmem:[#allocation5 + $0x88] ss:$20 sps:$4 sm:$0xff]   ;;  %v1477_v48 = vld [vmem:[#allocation5 + $0x38] ss:$20 sps:$4 sm:$0xff]   ;;  %v1478_v49 = vld [vmem:[#allocation5 + $0x10] ss:$20 sps:$4 sm:$0xff]  }
  0x5c   :  { %405 = vmatprep.subr.bf16.mxu0 %v1447_v16  ;;  %445 = vmatpush1.bf16.msra.mxu1 %v1446_v17  ;;  %v1491_v45 = vld [vmem:[#allocation8 + $0x18] sm:$0xff]   ;;  %v1494_v47 = vld [vmem:[#allocation8 + $0x10] sm:$0xff]   ;;  %v1486_v54 = vld [vmem:[#allocation10 + $0x68] sm:$0xff]   ;;  %v166_v7 = vsub.s32 0, %v165_v6  ;;  %v174_v9 = vsub.s32 2, %v165_v6  ;;  %v170_v10 = vsub.s32 1, %v165_v6 }
  0x5d   :  { %446 = vmatprep.subr.bf16.mxu1 %v1450_v18  ;;  %v1480_v50 = vld [vmem:[#allocation10 + $0x78] sm:$0xff]   ;;  %v1483_v52 = vld [vmem:[#allocation10 + $0x70] sm:$0xff]   ;;  %v1487_v55 = vld [vmem:[#allocation10 + $0x28] sm:$0xff]  }
  0x5e   :  { %v1481_v51 = vld [vmem:[#allocation10 + $0x38] sm:$0xff]   ;;  %v1484_v53 = vld [vmem:[#allocation10 + $0x30] sm:$0xff]   ;;  %v1489_v56 = vld [vmem:[#allocation10 + $0x60] sm:$0xff]   ;;  %v167_v11 = vrot.slane %v162_v8, %v166_v7  ;;  %v175_v12 = vrot.slane %v162_v8, %v174_v9  ;;  %v171_v13 = vrot.slane %v162_v8, %v170_v10 }
  0x5f   :  { %406 = vmatpush1.bf16.msra.mxu0 %v1449_v19  ;;  %v1490_v57 = vld [vmem:[#allocation10 + $0x20] sm:$0xff]   ;;  %v1492_v58 = vld [vmem:[#allocation10 + $0x58] sm:$0xff]   ;;  %v1495_v60 = vld [vmem:[#allocation10 + $0x50] sm:$0xff]  }
  0x60   :  { %407 = vmatprep.subr.bf16.mxu0 %v1453_v20  ;;  %447 = vmatpush1.bf16.msra.mxu1 %v1452_v21  ;;  %v1493_v59 = vld [vmem:[#allocation10 + $0x18] sm:$0xff]   ;;  %v1496_v61 = vld [vmem:[#allocation10 + $0x10] sm:$0xff]   ;;  %v1497_v62 = vld [vmem:[#allocation8 + $0x8] sm:$0xff]  }
  0x61   :  { %448 = vmatprep.subr.bf16.mxu1 %v1456_v22  ;;  %v1498_v63 = vld [vmem:[#allocation10 + $0x48] sm:$0xff]   ;;  %v1500_v1 = vld [vmem:[#allocation8] sm:$0xff]   ;;  %v1503_v4 = vld [vmem:[#allocation10 + $0xf8] sm:$0xff]  }
  0x62   :  { %v1499_v0 = vld [vmem:[#allocation10 + $0x8] sm:$0xff]   ;;  %v1501_v2 = vld [vmem:[#allocation10 + $0x40] sm:$0xff]   ;;  %v1504_v22 = vld [vmem:[#allocation10 + $0xb8] sm:$0xff]  }
  0x63   :  { %408 = vmatpush1.bf16.msra.mxu0 %v1455_v23  ;;  %v1502_v3 = vld [vmem:[#allocation10] sm:$0xff]   ;;  %v1506_v32 = vld [vmem:[#allocation10 + $0xb0] sm:$0xff]   ;;  %v1531_v9 = vld [vmem:[#allocation11 + $0x48] sm:$0xff]  }
  0x64   :  { %409 = vmatprep.subr.bf16.mxu0 %v1459_v24  ;;  %449 = vmatpush1.bf16.msra.mxu1 %v1458_v25  ;;  %v1529_v7 = vld [vmem:[#allocation11 + $0x50] sm:$0xff]   ;;  %v1532_v10 = vld [vmem:[#allocation11 + $0x8] sm:$0xff]  }
  0x65   :  { %450 = vmatprep.subr.bf16.mxu1 %v1462_v27  ;;  %v1505_v27 = vld [vmem:[#allocation10 + $0xf0] sm:$0xff]  }
  0x67   :  { %410 = vmatpush1.bf16.msra.mxu0 %v1461_v26 }
  0x68   :  { %411 = vmatprep.subr.bf16.mxu0 %v1465_v29  ;;  %451 = vmatpush1.bf16.msra.mxu1 %v1464_v28 }
  0x69   :  { %452 = vmatprep.subr.bf16.mxu1 %v1468_v31 }
  0x6b   :  { %412 = vmatpush1.bf16.msra.mxu0 %v1467_v30 }
  0x6c   :  { %1369 = vmatprep.subr.bf16.mxu0 %v1702_v36  ;;  %453 = vmatpush1.bf16.msra.mxu1 %v1470_v33 }
  0x6d   :  { %1389 = vmatprep.subr.bf16.mxu1 %v1702_v36 }
  0x6e   :  { %430 = vmatmul.mubr.bf16.vlgmr.msra.gmra.mxu0 %v113_v34 }
  0x6f   :  { %1370 = vmatpush3.bf16.msra.mxu0 %v1471_v35  ;;  %1385 = vmatprep.mubr.msk.bf16.mxu0 %vm1703_vm0, %v1702_v36  ;;  %v1508_v35 = vld [vmem:[#allocation10 + $0xa8] sm:$0xff]  }
  0x70   :  { %471 = vmatmul.mubr.bf16.vlgmr.msra.gmra.mxu1 %v113_v34  ;;  %1371 = vmatprep.subr.bf16.mxu0 %v1702_v36 }
  0x71   :  { %1390 = vmatpush3.bf16.msra.mxu1 %v1479_v37  ;;  %1405 = vmatprep.mubr.msk.bf16.mxu1 %vm1703_vm0, %v1702_v36  ;;  %v1510_v37 = vld [vmem:[#allocation10 + $0xa0] sm:$0xff]  }
  0x72   :  { %1391 = vmatprep.subr.bf16.mxu1 %v1702_v36 }
  0x73   :  { %1372 = vmatpush3.bf16.msra.mxu0 %v1472_v38  ;;  %v1511_v38 = vld [vmem:[#allocation10 + $0xd8] sm:$0xff]  }
  0x74   :  { %1373 = vmatprep.subr.bf16.mxu0 %v1702_v36 }
  0x75   :  { %1392 = vmatpush3.bf16.msra.mxu1 %v1482_v39  ;;  %v1512_v39 = vld [vmem:[#allocation10 + $0x98] sm:$0xff]  }
  0x76   :  { %1393 = vmatprep.subr.bf16.mxu1 %v1702_v36 }
  0x77   :  { %1374 = vmatpush3.bf16.msra.mxu0 %v1473_v40  ;;  %v1513_v40 = vld [vmem:[#allocation10 + $0xd0] sm:$0xff]  }
  0x78   :  { %1375 = vmatprep.subr.bf16.mxu0 %v1702_v36 }
  0x79   :  { %1394 = vmatpush3.bf16.msra.mxu1 %v1485_v41  ;;  %v178_v41 = vsub.s32 3, %v165_v6 }
  0x7a   :  { %1395 = vmatprep.subr.bf16.mxu1 %v1702_v36 }
  0x7b   :  { %1376 = vmatpush3.bf16.msra.mxu0 %v1474_v42  ;;  %v1514_v42 = vld [vmem:[#allocation10 + $0x90] sm:$0xff]  }
  0x7c   :  { %1377 = vmatprep.subr.bf16.mxu0 %v1702_v36 }
  0x7d   :  { %1396 = vmatpush3.bf16.msra.mxu1 %v1488_v43  ;;  %v182_v43 = vsub.s32 4, %v165_v6  ;;  %v1528_v6 = vld [vmem:[#allocation11 + $0x18] sm:$0xff]  }
  0x7e   :  { %1397 = vmatprep.subr.bf16.mxu1 %v1702_v36 }
  0x7f   :  { %1378 = vmatpush3.bf16.msra.mxu0 %v1475_v44  ;;  %v1515_v44 = vld [vmem:[#allocation10 + $0xc8] sm:$0xff]  }
  0x80   :  { %1379 = vmatprep.subr.bf16.mxu0 %v1702_v36 }
  0x81   :  { %1398 = vmatpush3.bf16.msra.mxu1 %v1491_v45  ;;  %v179_v45 = vrot.slane %v162_v8, %v178_v41 }
  0x82   :  { %1399 = vmatprep.subr.bf16.mxu1 %v1702_v36 }
  0x83   :  { %1380 = vmatpush3.bf16.msra.mxu0 %v1476_v46  ;;  %v1516_v46 = vld [vmem:[#allocation10 + $0x88] sm:$0xff]  }
  0x84   :  { %1381 = vmatprep.subr.bf16.mxu0 %v1702_v36 }
  0x85   :  { %1400 = vmatpush3.bf16.msra.mxu1 %v1494_v47  ;;  %v183_v47 = vrot.slane %v162_v8, %v182_v43  ;;  %v1530_v8 = vld [vmem:[#allocation11 + $0x10] sm:$0xff]   ;;  %v1163_v43 = vand.u32 127, %v164_v5 }
  0x86   :  { %1401 = vmatprep.subr.bf16.mxu1 %v1702_v36 }
  0x87   :  { %1382 = vmatpush3.bf16.msra.mxu0 %v1477_v48  ;;  %v1517_v48 = vld [vmem:[#allocation10 + $0xc0] sm:$0xff]   ;;  %vm1164_vm1 = vcmp.lt.s32.totalorder %v1163_v43, 8 }
  0x88   :  { %1383 = vmatprep.subr.bf16.mxu0 %v1702_v36 }
  0x89   :  { %1402 = vmatpush3.bf16.msra.mxu1 %v1497_v62  ;;  %v1521_v62 = vld [vmem:[#allocation11 + $0x70] sm:$0xff]  }
  0x8a   :  { %1403 = vmatprep.subr.bf16.mxu1 %v1702_v36  ;;  %v1509_v36 = vld [vmem:[#allocation10 + $0xe0] sm:$0xff]  }
  0x8b   :  { %1384 = vmatpush3.bf16.msra.mxu0 %v1478_v49 }
  0x8c   :  { %1303 = vmatprep.subr.bf16.mxu0 %v1480_v50 }
  0x8d   :  { %1404 = vmatpush3.bf16.msra.mxu1 %v1500_v1  ;;  %v1524_v1 = vld [vmem:[#allocation11 + $0x28] sm:$0xff]  }
  0x8e   :  { %1386 = vmatmul.mubr.bf16.vlgmr.msra.gmra.mxu0 %v113_v34  ;;  %1325 = vmatprep.subr.bf16.mxu1 %v1503_v4  ;;  %v1507_v34 = vld [vmem:[#allocation10 + $0xe8] sm:$0xff]   ;;  %v1527_v4 = vld [vmem:[#allocation11 + $0x58] sm:$0xff]  }
  0x8f   :  { %1304 = vmatpush3.bf16.msra.mxu0 %v1481_v51  ;;  %v1518_v51 = vld [vmem:[#allocation10 + $0x80] sm:$0xff]  }
  0x90   :  { %1305 = vmatprep.subr.bf16.mxu0 %v1483_v52 }
  0x93   :  { %1306 = vmatpush3.bf16.msra.mxu0 %v1484_v53 }
  0x94   :  { %1307 = vmatprep.subr.bf16.mxu0 %v1486_v54 }
  0x97   :  { %1308 = vmatpush3.bf16.msra.mxu0 %v1487_v55 }
  0x98   :  { %1309 = vmatprep.subr.bf16.mxu0 %v1489_v56 }
  0x9b   :  { %1310 = vmatpush3.bf16.msra.mxu0 %v1490_v57 }
  0x9c   :  { %1311 = vmatprep.subr.bf16.mxu0 %v1492_v58 }
  0x9f   :  { %1312 = vmatpush3.bf16.msra.mxu0 %v1493_v59 }
  0xa0   :  { %1313 = vmatprep.subr.bf16.mxu0 %v1495_v60  ;;  %v1519_v60 = vld [vmem:[#allocation11 + $0x78] sm:$0xff]  }
  0xa3   :  { %1314 = vmatpush3.bf16.msra.mxu0 %v1496_v61  ;;  %v1520_v61 = vld [vmem:[#allocation11 + $0x38] sm:$0xff]  }
  0xa4   :  { %1315 = vmatprep.subr.bf16.mxu0 %v1498_v63  ;;  %v1522_v63 = vld [vmem:[#allocation11 + $0x30] sm:$0xff]  }
  0xa7   :  { %1316 = vmatpush3.bf16.msra.mxu0 %v1499_v0  ;;  %v1523_v0 = vld [vmem:[#allocation11 + $0x68] sm:$0xff]  }
  0xa8   :  { %1317 = vmatprep.subr.bf16.mxu0 %v1501_v2  ;;  %v1525_v2 = vld [vmem:[#allocation11 + $0x60] sm:$0xff]  }
  0xab   :  { %1318 = vmatpush3.bf16.msra.mxu0 %v1502_v3  ;;  %v1526_v3 = vld [vmem:[#allocation11 + $0x20] sm:$0xff]  }
  0xac   :  { %1347 = vmatprep.subr.bf16.mxu0 %v1519_v60 }
 0x12e   :  { %v431_v14 = vpop.f32.mrf.mxu0 }
 0x12f   :  { %v432_v15 = vadd.f32 %v431_v14, %v167_v11  ;;  %v1533_v11 = vld [vmem:[#allocation11 + $0x40] sm:$0xff]  }
 0x130   :  { %v472_v16 = vpop.f32.mrf.mxu1  ;;  %v433_v17 = vpop.f32.mrf.mxu0 }
 0x131   :  { %v519_v18 = vmax.f32 %v432_v15, 0.0  ;;  %v473_v19 = vadd.f32 %v472_v16, %v175_v12  ;;  %v434_v20 = vadd.f32 %v433_v17, %v171_v13  ;;  %v1534_v12 = vld [vmem:[#allocation11] sm:$0xff]  }
 0x132   :  { %v435_v21 = vpop.f32.mrf.mxu0  ;;  %v474_v23 = vpop.f32.mrf.mxu1 }
 0x133   :  { %v524_v24 = vpack.c.bf16 %v519_v18, %v519_v18  ;;  %v521_v25 = vmax.f32 %v473_v19, 0.0  ;;  %v520_v26 = vmax.f32 %v434_v20, 0.0  ;;  %v475_v49 = vadd.f32 %v474_v23, %v179_v45  ;;  %v1226_v21 = vld [vmem:[%s1818_s4] ss:$0 sm:$0xff] }
 0x134   :  { %v436_v28 = vpop.f32.mrf.mxu0  ;;  %v476_v29 = vpop.f32.mrf.mxu1  ;;  %v1235_v23 = vld [vmem:[%s1820_s6] ss:$0 sm:$0xff]  ;;  %s1704_s6 = smov [#allocation13]  }
 0x135   :  { %v638_v30 = vpack.c.bf16 %v521_v25, %v521_v25  ;;  %v637_v31 = vpack.c.bf16 %v520_v26, %v520_v26  ;;  %1406 = vmatmul.mubr.bf16.vlgmr.msra.gmra.mxu1 %v524_v24  ;;  %v522_v53 = vmax.f32 %v475_v49, 0.0  ;;  %s1174_s22 = sshll.u32 %s1704_s6, 4  ;;  %s1175_s22 = int_to_ptr.vmem [resolvable:$true] %s1174_s22 }
 0x136   :  { %1326 = vmatpush3.bf16.msra.mxu1 %v1504_v22  ;;  %v477_v33 = vpop.f32.mrf.mxu1  ;;  %s1661_s1 = scalar_lea.vmem %s1175_s22, 128  ;;  %p1666_p3 = scmp.lt.s32.totalorder %s1175_s22, %s1175_s22 }
 0x137   :  { %936 = vmatprep.mubr.bf16.mxu0 %v638_v30  ;;  %1327 = vmatprep.subr.bf16.mxu1 %v1505_v27  ;;  %v639_v58 = vpack.c.bf16 %v522_v53, %v522_v53  ;;  %p1662_p2 = scmp.ne.s32.totalorder %s1175_s22, %s1661_s1  ;;  %p1667_p4 = scmp.lt.s32.totalorder %s1661_s1, %s1661_s1 }
 0x138   :  { %937 = vmatmul.mubr.bf16.vlgmr.msra.gmra.mxu0 %v637_v31 }
 0x139   :  { %1348 = vmatpush3.bf16.msra.mxu0 %v1520_v61  ;;  %p1668_p5 = por %p1667_p4, %p1666_p3 }
 0x13a   :  { %1328 = vmatpush3.bf16.msra.mxu1 %v1506_v32  ;;  %1349 = vmatprep.subr.bf16.mxu0 %v1521_v62 }
 0x13b   :  { %1329 = vmatprep.subr.bf16.mxu1 %v1507_v34  ;;  %p1669_p6 = pnand %p1668_p5, %p1662_p2 }
 0x13d   :  { %1350 = vmatpush3.bf16.msra.mxu0 %v1522_v63 }
 0x13e   :  { %1330 = vmatpush3.bf16.msra.mxu1 %v1508_v35  ;;  %1351 = vmatprep.subr.bf16.mxu0 %v1523_v0 }
 0x13f   :  { %1331 = vmatprep.subr.bf16.mxu1 %v1509_v36 }
 0x141   :  { %1352 = vmatpush3.bf16.msra.mxu0 %v1524_v1 }
 0x142   :  { %1332 = vmatpush3.bf16.msra.mxu1 %v1510_v37  ;;  %1353 = vmatprep.subr.bf16.mxu0 %v1525_v2  ;;  %v1268_v37 = vld [vmem:[%s1822_s8] ss:$0 sm:$0xff] }
 0x143   :  { %1333 = vmatprep.subr.bf16.mxu1 %v1511_v38 }
 0x145   :  { %1354 = vmatpush3.bf16.msra.mxu0 %v1526_v3 }
 0x146   :  { %1334 = vmatpush3.bf16.msra.mxu1 %v1512_v39  ;;  %1355 = vmatprep.subr.bf16.mxu0 %v1527_v4 }
 0x147   :  { %1335 = vmatprep.subr.bf16.mxu1 %v1513_v40 }
 0x149   :  { %1356 = vmatpush3.bf16.msra.mxu0 %v1528_v6 }
 0x14a   :  { %1336 = vmatpush3.bf16.msra.mxu1 %v1514_v42  ;;  %1357 = vmatprep.subr.bf16.mxu0 %v1529_v7 }
 0x14b   :  { %1337 = vmatprep.subr.bf16.mxu1 %v1515_v44 }
 0x14d   :  { %1358 = vmatpush3.bf16.msra.mxu0 %v1530_v8 }
 0x14e   :  { %v513_v50 = vpop.f32.mrf.mxu0  ;;  %1338 = vmatpush3.bf16.msra.mxu1 %v1516_v46  ;;  %1359 = vmatprep.subr.bf16.mxu0 %v1531_v9 }
 0x14f   :  { %v514_v52 = vadd.f32 %v513_v50, %v183_v47  ;;  %1339 = vmatprep.subr.bf16.mxu1 %v1517_v48 }
 0x150   :  { %v1387_v54 = vpop.f32.mrf.mxu0 }
 0x151   :  { %v523_v55 = vmax.f32 %v514_v52, 0.0  ;;  %1360 = vmatpush3.bf16.msra.mxu0 %v1532_v10 }
 0x152   :  { %v516_v56 = vpop.f32.mrf.mxu0  ;;  %1340 = vmatpush3.bf16.msra.mxu1 %v1518_v51  ;;  %1361 = vmatprep.subr.bf16.mxu0 %v1533_v11 }
 0x153   :  { %v640_v57 = vpack.c.bf16 %v523_v55, %v523_v55 }
 0x154   :  { %v1388_v59 = vpop.f32.mrf.mxu0 }
 0x155   :  { %976 = vmatprep.mubr.bf16.mxu1 %v640_v57  ;;  %1362 = vmatpush3.bf16.msra.mxu0 %v1534_v12 }
 0x156   :  { %977 = vmatmul.mubr.bf16.vlgmr.msra.gmra.mxu1 %v639_v58 }
 0x1f5   :  { %v630_v13 = vpop.f32.mrf.mxu1 }
 0x1f6   :  { %v631_v25 = vadd.f32 %v1226_v21, %v630_v13 }
 0x1f7   :  { %v1407_v14 = vpop.f32.mrf.mxu1 }
 0x1f8   :  { %v1319_v15 = vpop.f32.mrf.mxu0  ;;  %1535 = vtanh.f32 %v631_v25 }
 0x1f9   :  { %v633_v16 = vpop.f32.mrf.mxu1 }
 0x1fa   :  { %v1320_v17 = vpop.f32.mrf.mxu0 }
 0x1fb   :  { %v1408_v18 = vpop.f32.mrf.mxu1  ;;  %v1321_v22 = vadd.f32 %v1320_v17, %v1319_v15 }
 0x1fc   :  { %v1322_v19 = vpop.f32.mrf.mxu0 }
 0x1fd   :  { %v939_v27 = vadd.f32 %v1321_v22, %v1235_v23 }
 0x1fe   :  { %v1323_v20 = vpop.f32.mrf.mxu0 }
 0x205   :  { %v1536_v32 = vpop.eup %1535 }
 0x206   :  { %v985_v35 = vpack.c.bf16 %v1536_v32, %v1536_v32 }
 0x216   :  { %v1341_v24 = vpop.f32.mrf.mxu1 }
 0x218   :  { %v1342_v26 = vpop.f32.mrf.mxu1 }
 0x219   :  { %v1343_v28 = vadd.f32 %v1342_v26, %v1341_v24 }
 0x21a   :  { %v1344_v29 = vpop.f32.mrf.mxu1 }
 0x21b   :  { %v979_v30 = vadd.f32 %v1343_v28, %v939_v27 }
 0x21c   :  { %v1345_v31 = vpop.f32.mrf.mxu1 }
 0x21d   :  { %1537 = vtanh.f32 %v979_v30 }
 0x22a   :  { %v1538_v33 = vpop.eup %1537 }
 0x22b   :  { %v986_v34 = vpack.c.bf16 %v1538_v33, %v1538_v33 }
 0x22d   :  { %1154 = vmatprep.mubr.bf16.mxu0 %v986_v34 }
 0x22e   :  { %1155 = vmatmul.mubr.bf16.vlgmr.msra.gmra.mxu0 %v985_v35 }
 0x2ee   :  { %v1363_v36 = vpop.f32.mrf.mxu0 }
 0x2f0   :  { %v1364_v38 = vpop.f32.mrf.mxu0 }
 0x2f1   :  { %v1365_v39 = vadd.f32 %v1364_v38, %v1363_v36 }
 0x2f2   :  { %v1366_v40 = vpop.f32.mrf.mxu0 }
 0x2f3   :  { %v1157_v41 = vadd.f32 %v1365_v39, %v1268_v37 }
 0x2f4   :  { %v1367_v42 = vpop.f32.mrf.mxu0 }
 0x2f5   :  { %1539 = vtanh.f32 %v1157_v41 }
 0x302   :  { %v1540_v44 = vpop.eup %1539 }
 0x303   :  { %v1166_v45 = vsel %vm1164_vm1, %v1540_v44, %v1157_v41 }
 0x304   :  { %1167 = vst [vmem:[#allocation13] sm:$0xff] %v1166_v45 }
 0x305   :  { %1672 = shalt.err (!%p1669_p6)
}
 0x306   :  { %1177 = dma.vmem_to_hbm [thread:$0]  %s1175_s22, 128, %s1823_s9, [#allocation4]  }
 0x307   :  { %1689 = dma.done.wait [#allocation4], 128  }
 0x308   :  { %1690 = vsyncadd [#allocation4], 4294967168 }
 0x309   :  { %1181 = vsyncpa [#allocation3], 1 }
 0x30a   :  { %1182 = vsyncpa [#allocation6], 1 }
 0x30b   :  { %1183 = vsyncpa [#allocation9], 1 }
 0x30c   :  { %1184 = vsyncpa [#allocation12], 1 }
 0x30d   :  { %1185 = vsyncpa [#allocation4], 1 }

</bundles_post_ra>
